<compile_context>
chip_gen: v5e
topology: v5e:2x2
jax: 0.10.0
libtpu: 0.0.40
codegen_flags: <defaults>
</compile_context>

<pallas_src>
import math

import jax
import jax.numpy as jnp
from jax.experimental import pallas as pl
from jax.experimental.pallas import tpu as pltpu

# Problem sizes (small, consistent with the module's forward).
BATCH = 2
TOKENS = 8
FT_DIM = 32
SD_DIM = 32          # == att_dim
FDT_NUM = 16
TEMPERATURE = 1.0
LN_EPS = 1e-5        # PyTorch nn.LayerNorm default

_SQRT_2_OVER_PI = math.sqrt(2.0 / math.pi)


def _gelu_tanh(x):
    # tanh-approximation GELU (|err| vs exact erf GELU is a few e-4).
    # tanh executes on the EUP slot, keeping the serial VPU chain short.
    return 0.5 * x * (1.0 + jnp.tanh(_SQRT_2_OVER_PI * (x + 0.044715 * (x * x * x))))


def _layernorm(x, gamma, beta):
    mu = jnp.mean(x, axis=-1, keepdims=True)
    var = jnp.mean((x - mu) ** 2, axis=-1, keepdims=True)
    return (x - mu) * jax.lax.rsqrt(var + LN_EPS) * gamma + beta


def make_query_model_kernel(B, T, F, S, N, out_rows, out_cols):
    """Kernel closure over the (static) problem sizes and slab layout."""
    assert F == S, "parameter-slab packing assumes ft_dim == sd_dim"

    # Static row offsets inside the packed parameter slab (all multiples of 8
    # for the big blocks, so every slice is sublane-aligned).
    SD_OFF = 0
    W1_OFF = SD_OFF + N
    W2_OFF = W1_OFF + F
    V_OFF = W2_OFF + S
    scale = 1.0 / (math.sqrt(S) * TEMPERATURE)

    def kernel(ft_ref, p_ref, out_ref):
        x = ft_ref[...]                                     # [B*T, F]

        # Unpack the parameter slab (static slices — free).
        sd = p_ref[SD_OFF:SD_OFF + N, :]                    # [N, S]
        w1 = p_ref[W1_OFF:W1_OFF + F, :]                    # [F, S]
        w2 = p_ref[W2_OFF:W2_OFF + S, :]                    # [S, S]
        g1 = p_ref[V_OFF + 0:V_OFF + 1, :]                  # LN1 gamma
        b1 = p_ref[V_OFF + 1:V_OFF + 2, :]                  # LN1 beta
        c1 = p_ref[V_OFF + 2:V_OFF + 3, :]                  # Linear1 bias
        g2 = p_ref[V_OFF + 3:V_OFF + 4, :]                  # LN2 gamma
        b2 = p_ref[V_OFF + 4:V_OFF + 5, :]                  # LN2 beta
        c2 = p_ref[V_OFF + 5:V_OFF + 6, :]                  # Linear2 bias

        # q_map (token-wise part): LayerNorm -> Linear -> GELU -> LayerNorm,
        # fused over all batches at once.
        x = _layernorm(x, g1, b1)
        h = jnp.dot(x, w1, preferred_element_type=jnp.float32) + c1
        h = _gelu_tanh(h)
        h = _layernorm(h, g2, b2)                           # [B*T, S]

        # pool_type == 'sum', mask == None:
        #   sum_t((h_t @ w2 + c2) @ sd^T) == ((sum_t h_t) @ w2 + T*c2) @ sd^T
        # so pool tokens first (sublane reduce on the XLU), then one tiny
        # matmul per stage — no one-hot pooling matmul, no [T, N] matrix.
        # TODO(synk): mask path / 'mean'/'max'/'none' pooling and the
        #             sigmoid/sparsemax activations are not implemented
        #             (module defaults only).
        h_sum = jnp.sum(h.reshape(B, T, S), axis=1)         # [B, S]
        q_sum = jnp.dot(h_sum, w2, preferred_element_type=jnp.float32) + T * c2

        logits = jax.lax.dot_general(q_sum, sd, (((1,), (1,)), ((), ())),
                                     preferred_element_type=jnp.float32)
        logits = logits * scale                             # [B, N]

        # att_func_type == 'softmax' over the FDT axis (exact divide: the
        # denominator is only (B, 1), so this is off every saturated slot).
        m = jnp.max(logits, axis=-1, keepdims=True)
        e = jnp.exp(logits - m)
        att_w = e / jnp.sum(e, axis=-1, keepdims=True)      # [B, N]

        att_ft = jnp.dot(att_w, sd, preferred_element_type=jnp.float32)  # [B, S]

        # Single lane-dense output tile: [ att_w | att_ft | 0-pad ].
        out_ref[...] = jnp.zeros((out_rows, out_cols), jnp.float32)
        out_ref[0:B, 0:N + S] = jnp.concatenate([att_w, att_ft], axis=1)

    return kernel


def pack_params(sd, params):
    """Pack sd + all q_map parameters into one slab. Run ONCE per param set."""
    g1, b1, w1, c1, g2, b2, w2, c2 = params
    N, S = sd.shape
    F = w1.shape[0]
    assert F == S, "parameter-slab packing assumes ft_dim == sd_dim"
    vecs = jnp.concatenate([g1, b1, c1, g2, b2, c2], axis=0)       # [6, S]
    slab = jnp.concatenate([sd, w1, w2, vecs], axis=0)             # [N+F+S+6, S]
    pad = (-slab.shape[0]) % 8
    if pad:
        slab = jnp.concatenate([slab, jnp.zeros((pad, S), slab.dtype)], axis=0)
    return slab


def _forward(ft, param_slab):
    B, T, F = ft.shape
    N, S = FDT_NUM, SD_DIM
    out_rows = max(8, ((B + 7) // 8) * 8)
    out_cols = max(128, ((N + S + 127) // 128) * 128)

    ft_flat = ft.reshape(B * T, F)
    vmem = pl.BlockSpec(memory_space=pltpu.MemorySpace.VMEM)

    out = pl.pallas_call(
        make_query_model_kernel(B, T, F, S, N, out_rows, out_cols),
        out_shape=jax.ShapeDtypeStruct((out_rows, out_cols), jnp.float32),
        in_specs=[vmem, vmem],
        out_specs=vmem,
    )(ft_flat, param_slab)

    att_w = out[:B, :N]
    att_ft = out[:B, N:N + S]
    return att_w, att_ft


query_model_forward = jax.jit(_forward)


def reference_forward(ft, sd, params):
    """Pure-JAX reference mirroring the PyTorch forward (default flags)."""
    g1, b1, w1, c1, g2, b2, w2, c2 = params
    x = ft
    mu = x.mean(-1, keepdims=True)
    var = ((x - mu) ** 2).mean(-1, keepdims=True)
    x = (x - mu) / jnp.sqrt(var + LN_EPS) * g1[0] + b1[0]
    h = x @ w1 + c1[0]
    h = jax.nn.gelu(h, approximate=False)
    mu = h.mean(-1, keepdims=True)
    var = ((h - mu) ** 2).mean(-1, keepdims=True)
    h = (h - mu) / jnp.sqrt(var + LN_EPS) * g2[0] + b2[0]
    q = h @ w2 + c2[0]
    inner = jnp.einsum('btd,nd->btn', q, sd) / math.sqrt(SD_DIM) / TEMPERATURE
    pooled = inner.sum(1)
    att_w = jax.nn.softmax(pooled, axis=-1)
    att_ft = att_w @ sd
    return att_w, att_ft, sd


if __name__ == "__main__":
    key = jax.random.PRNGKey(0)
    k = jax.random.split(key, 10)

    ft = jax.random.normal(k[0], (BATCH, TOKENS, FT_DIM), jnp.float32)
    sd = jax.random.normal(k[1], (FDT_NUM, SD_DIM), jnp.float32)

    # Deterministic synthetic parameters (shapes from Query_model.__init__).
    g1 = 1.0 + 0.01 * jax.random.normal(k[2], (1, FT_DIM), jnp.float32)
    b1 = 0.01 * jax.random.normal(k[3], (1, FT_DIM), jnp.float32)
    w1 = 0.05 * jax.random.normal(k[4], (FT_DIM, SD_DIM), jnp.float32)
    c1 = 0.01 * jax.random.normal(k[5], (1, SD_DIM), jnp.float32)
    g2 = 1.0 + 0.01 * jax.random.normal(k[6], (1, SD_DIM), jnp.float32)
    b2 = 0.01 * jax.random.normal(k[7], (1, SD_DIM), jnp.float32)
    w2 = 0.05 * jax.random.normal(k[8], (SD_DIM, SD_DIM), jnp.float32)
    c2 = 0.01 * jax.random.normal(k[9], (1, SD_DIM), jnp.float32)
    params = (g1, b1, w1, c1, g2, b2, w2, c2)

    # Parameter packing happens ONCE, outside the forward path.
    param_slab = pack_params(sd, params)

    att_w, att_ft = query_model_forward(ft, param_slab)
    sd_out = sd                      # the module returns sd unchanged
    jax.block_until_ready((att_w, att_ft, sd_out))

    ref_w, ref_ft, _ = reference_forward(ft, sd, params)
    # 2e-3 tolerance absorbs the tanh-GELU approximation (the reference uses
    # the exact erf GELU, like PyTorch); everything else in the kernel is
    # exact f32 (the softmax divide is exact again).
    assert att_w.shape == (BATCH, FDT_NUM) and att_ft.shape == (BATCH, SD_DIM)
    assert jnp.allclose(att_w, ref_w, atol=2e-3, rtol=2e-3), "att_weight mismatch"
    assert jnp.allclose(att_ft, ref_ft, atol=2e-3, rtol=2e-3), "att_ft mismatch"

    print("KERNEL_OK")
</pallas_src>

<mosaic_0001>
module attributes {stable_mosaic.version = 11 : i64} {
  func.func @kernel(%arg0: memref<16x32xf32, #tpu.memory_space<vmem>>, %arg1: memref<88x32xf32, #tpu.memory_space<vmem>>, %arg2: memref<8x128xf32, #tpu.memory_space<vmem>>) attributes {dimension_semantics = [], scalar_prefetch = 0 : i64, scratch_operands = 0 : i64, tpu.core_type = #tpu.core_type<tc>} {
    %c0 = arith.constant 0 : index
    %c0_0 = arith.constant 0 : index
    %0 = vector.load %arg0[%c0, %c0_0] : memref<16x32xf32, #tpu.memory_space<vmem>>, vector<16x32xf32>
    %c0_1 = arith.constant 0 : index
    %c0_2 = arith.constant 0 : index
    %1 = vector.load %arg1[%c0_1, %c0_2] : memref<88x32xf32, #tpu.memory_space<vmem>>, vector<16x32xf32>
    %c16 = arith.constant 16 : index
    %c0_3 = arith.constant 0 : index
    %2 = vector.load %arg1[%c16, %c0_3] : memref<88x32xf32, #tpu.memory_space<vmem>>, vector<32x32xf32>
    %c48 = arith.constant 48 : index
    %c0_4 = arith.constant 0 : index
    %3 = vector.load %arg1[%c48, %c0_4] : memref<88x32xf32, #tpu.memory_space<vmem>>, vector<32x32xf32>
    %c80 = arith.constant 80 : index
    %c0_5 = arith.constant 0 : index
    %4 = vector.load %arg1[%c80, %c0_5] : memref<88x32xf32, #tpu.memory_space<vmem>>, vector<1x32xf32>
    %c81 = arith.constant 81 : index
    %c0_6 = arith.constant 0 : index
    %5 = vector.load %arg1[%c81, %c0_6] : memref<88x32xf32, #tpu.memory_space<vmem>>, vector<1x32xf32>
    %c82 = arith.constant 82 : index
    %c0_7 = arith.constant 0 : index
    %6 = vector.load %arg1[%c82, %c0_7] : memref<88x32xf32, #tpu.memory_space<vmem>>, vector<1x32xf32>
    %c83 = arith.constant 83 : index
    %c0_8 = arith.constant 0 : index
    %7 = vector.load %arg1[%c83, %c0_8] : memref<88x32xf32, #tpu.memory_space<vmem>>, vector<1x32xf32>
    %c84 = arith.constant 84 : index
    %c0_9 = arith.constant 0 : index
    %8 = vector.load %arg1[%c84, %c0_9] : memref<88x32xf32, #tpu.memory_space<vmem>>, vector<1x32xf32>
    %c85 = arith.constant 85 : index
    %c0_10 = arith.constant 0 : index
    %9 = vector.load %arg1[%c85, %c0_10] : memref<88x32xf32, #tpu.memory_space<vmem>>, vector<1x32xf32>
    %cst = arith.constant dense<0.000000e+00> : vector<16xf32>
    %10 = vector.multi_reduction <add>, %0, %cst [1] : vector<16x32xf32> to vector<16xf32>
    %11 = vector.shape_cast %10 : vector<16xf32> to vector<16x1xf32>
    %cst_11 = arith.constant 3.200000e+01 : f32
    %12 = vector.broadcast %cst_11 : f32 to vector<16x1xf32>
    %13 = arith.divf %11, %12 : vector<16x1xf32>
    %14 = vector.broadcast %13 : vector<16x1xf32> to vector<16x32xf32>
    %15 = arith.subf %0, %14 : vector<16x32xf32>
    %16 = arith.mulf %15, %15 : vector<16x32xf32>
    %cst_12 = arith.constant dense<0.000000e+00> : vector<16xf32>
    %17 = vector.multi_reduction <add>, %16, %cst_12 [1] : vector<16x32xf32> to vector<16xf32>
    %18 = vector.shape_cast %17 : vector<16xf32> to vector<16x1xf32>
    %cst_13 = arith.constant 3.200000e+01 : f32
    %19 = vector.broadcast %cst_13 : f32 to vector<16x1xf32>
    %20 = arith.divf %18, %19 : vector<16x1xf32>
    %21 = vector.broadcast %13 : vector<16x1xf32> to vector<16x32xf32>
    %22 = arith.subf %0, %21 : vector<16x32xf32>
    %cst_14 = arith.constant 9.99999974E-6 : f32
    %23 = vector.broadcast %cst_14 : f32 to vector<16x1xf32>
    %24 = arith.addf %20, %23 : vector<16x1xf32>
    %25 = math.rsqrt %24 : vector<16x1xf32>
    %26 = vector.broadcast %25 : vector<16x1xf32> to vector<16x32xf32>
    %27 = arith.mulf %22, %26 : vector<16x32xf32>
    %28 = vector.broadcast %4 : vector<1x32xf32> to vector<16x32xf32>
    %29 = arith.mulf %27, %28 : vector<16x32xf32>
    %30 = vector.broadcast %5 : vector<1x32xf32> to vector<16x32xf32>
    %31 = arith.addf %29, %30 : vector<16x32xf32>
    %cst_15 = arith.constant dense<0.000000e+00> : vector<16x32xf32>
    %32 = tpu.matmul %31, %2, %cst_15 {dimension_numbers = #tpu.dot_dimension_numbers<[1], [0], [0], [1], [0, 0, 1, 1], [], []>} : vector<16x32xf32>, vector<32x32xf32>, vector<16x32xf32> -> vector<16x32xf32>
    %33 = vector.broadcast %6 : vector<1x32xf32> to vector<16x32xf32>
    %34 = arith.addf %32, %33 : vector<16x32xf32>
    %cst_16 = arith.constant 5.000000e-01 : f32
    %35 = vector.broadcast %cst_16 : f32 to vector<16x32xf32>
    %36 = arith.mulf %35, %34 : vector<16x32xf32>
    %37 = arith.mulf %34, %34 : vector<16x32xf32>
    %38 = arith.mulf %37, %34 : vector<16x32xf32>
    %cst_17 = arith.constant 4.471500e-02 : f32
    %39 = vector.broadcast %cst_17 : f32 to vector<16x32xf32>
    %40 = arith.mulf %39, %38 : vector<16x32xf32>
    %41 = arith.addf %34, %40 : vector<16x32xf32>
    %cst_18 = arith.constant 0.797884583 : f32
    %42 = vector.broadcast %cst_18 : f32 to vector<16x32xf32>
    %43 = arith.mulf %42, %41 : vector<16x32xf32>
    %44 = math.tanh %43 : vector<16x32xf32>
    %cst_19 = arith.constant 1.000000e+00 : f32
    %45 = vector.broadcast %cst_19 : f32 to vector<16x32xf32>
    %46 = arith.addf %45, %44 : vector<16x32xf32>
    %47 = arith.mulf %36, %46 : vector<16x32xf32>
    %cst_20 = arith.constant dense<0.000000e+00> : vector<16xf32>
    %48 = vector.multi_reduction <add>, %47, %cst_20 [1] : vector<16x32xf32> to vector<16xf32>
    %49 = vector.shape_cast %48 : vector<16xf32> to vector<16x1xf32>
    %cst_21 = arith.constant 3.200000e+01 : f32
    %50 = vector.broadcast %cst_21 : f32 to vector<16x1xf32>
    %51 = arith.divf %49, %50 : vector<16x1xf32>
    %52 = vector.broadcast %51 : vector<16x1xf32> to vector<16x32xf32>
    %53 = arith.subf %47, %52 : vector<16x32xf32>
    %54 = arith.mulf %53, %53 : vector<16x32xf32>
    %cst_22 = arith.constant dense<0.000000e+00> : vector<16xf32>
    %55 = vector.multi_reduction <add>, %54, %cst_22 [1] : vector<16x32xf32> to vector<16xf32>
    %56 = vector.shape_cast %55 : vector<16xf32> to vector<16x1xf32>
    %cst_23 = arith.constant 3.200000e+01 : f32
    %57 = vector.broadcast %cst_23 : f32 to vector<16x1xf32>
    %58 = arith.divf %56, %57 : vector<16x1xf32>
    %59 = vector.broadcast %51 : vector<16x1xf32> to vector<16x32xf32>
    %60 = arith.subf %47, %59 : vector<16x32xf32>
    %cst_24 = arith.constant 9.99999974E-6 : f32
    %61 = vector.broadcast %cst_24 : f32 to vector<16x1xf32>
    %62 = arith.addf %58, %61 : vector<16x1xf32>
    %63 = math.rsqrt %62 : vector<16x1xf32>
    %64 = vector.broadcast %63 : vector<16x1xf32> to vector<16x32xf32>
    %65 = arith.mulf %60, %64 : vector<16x32xf32>
    %66 = vector.broadcast %7 : vector<1x32xf32> to vector<16x32xf32>
    %67 = arith.mulf %65, %66 : vector<16x32xf32>
    %68 = vector.broadcast %8 : vector<1x32xf32> to vector<16x32xf32>
    %69 = arith.addf %67, %68 : vector<16x32xf32>
    %70 = vector.shape_cast %69 : vector<16x32xf32> to vector<2x8x32xf32>
    %cst_25 = arith.constant dense<0.000000e+00> : vector<2x32xf32>
    %71 = vector.multi_reduction <add>, %70, %cst_25 [1] : vector<2x8x32xf32> to vector<2x32xf32>
    %cst_26 = arith.constant dense<0.000000e+00> : vector<2x32xf32>
    %72 = tpu.matmul %71, %3, %cst_26 {dimension_numbers = #tpu.dot_dimension_numbers<[1], [0], [0], [1], [0, 0, 1, 1], [], []>} : vector<2x32xf32>, vector<32x32xf32>, vector<2x32xf32> -> vector<2x32xf32>
    %cst_27 = arith.constant 8.000000e+00 : f32
    %73 = vector.broadcast %cst_27 : f32 to vector<1x32xf32>
    %74 = arith.mulf %73, %9 : vector<1x32xf32>
    %75 = vector.broadcast %74 : vector<1x32xf32> to vector<2x32xf32>
    %76 = arith.addf %72, %75 : vector<2x32xf32>
    %cst_28 = arith.constant dense<0.000000e+00> : vector<2x16xf32>
    %77 = tpu.matmul %76, %1, %cst_28 {dimension_numbers = #tpu.dot_dimension_numbers<[1], [1], [0], [0], [0, 0, 1, 0], [], []>} : vector<2x32xf32>, vector<16x32xf32>, vector<2x16xf32> -> vector<2x16xf32>
    %cst_29 = arith.constant 0.176776692 : f32
    %78 = vector.broadcast %cst_29 : f32 to vector<2x16xf32>
    %79 = arith.mulf %77, %78 : vector<2x16xf32>
    %cst_30 = arith.constant dense<0xFF800000> : vector<2xf32>
    %80 = vector.multi_reduction <maximumf>, %79, %cst_30 [1] : vector<2x16xf32> to vector<2xf32>
    %81 = vector.shape_cast %80 : vector<2xf32> to vector<2x1xf32>
    %82 = vector.broadcast %81 : vector<2x1xf32> to vector<2x16xf32>
    %83 = arith.subf %79, %82 : vector<2x16xf32>
    %84 = math.exp %83 : vector<2x16xf32>
    %cst_31 = arith.constant dense<0.000000e+00> : vector<2xf32>
    %85 = vector.multi_reduction <add>, %84, %cst_31 [1] : vector<2x16xf32> to vector<2xf32>
    %86 = vector.shape_cast %85 : vector<2xf32> to vector<2x1xf32>
    %87 = vector.broadcast %86 : vector<2x1xf32> to vector<2x16xf32>
    %88 = arith.divf %84, %87 : vector<2x16xf32>
    %cst_32 = arith.constant dense<0.000000e+00> : vector<2x32xf32>
    %89 = tpu.matmul %88, %1, %cst_32 {dimension_numbers = #tpu.dot_dimension_numbers<[1], [0], [0], [1], [0, 0, 1, 1], [], []>} : vector<2x16xf32>, vector<16x32xf32>, vector<2x32xf32> -> vector<2x32xf32>
    %cst_33 = arith.constant 0.000000e+00 : f32
    %90 = vector.broadcast %cst_33 : f32 to vector<8x128xf32>
    %c0_34 = arith.constant 0 : index
    %c0_35 = arith.constant 0 : index
    %91 = vector.load %arg2[%c0_34, %c0_35] : memref<8x128xf32, #tpu.memory_space<vmem>>, vector<8x128xf32>
    tpu.vector_store %arg2[%c0_34, %c0_35], %90 {strides = array<i32>} : memref<8x128xf32, #tpu.memory_space<vmem>>, vector<8x128xf32>,
    %92 = tpu.concatenate %88, %89 in 1 : vector<2x16xf32>, vector<2x32xf32> -> vector<2x48xf32>
    %c0_36 = arith.constant 0 : index
    %c0_37 = arith.constant 0 : index
    %93 = vector.load %arg2[%c0_36, %c0_37] : memref<8x128xf32, #tpu.memory_space<vmem>>, vector<2x48xf32>
    tpu.vector_store %arg2[%c0_36, %c0_37], %92 {strides = array<i32>} : memref<8x128xf32, #tpu.memory_space<vmem>>, vector<2x48xf32>,
    return
  }
}

</mosaic_0001>

<bundles_post_ra>
// kernel: _forward.1
= control target key start
LH: loop header
LB: loop body
LE: loop exit
PB: predicated region body
PF: predicated region fallthrough
CT: control target
= control target key end

     0   :  { %vm29_vm0 = vcmask 261120   ;;  %v351_v4 = vmov 32.0   ;;  %vm203_vm14 = vcmask 1041409   ;;  %vm257_vm15 = vcmask 123904   ;;  %s353_s16 = smov 16   ;;  %s455_s0 = inlined_call_operand.vmem [shape: f32[16,32], index: 0, kind: input, shape index: {}]   ;;  %s456_s1 = inlined_call_operand.vmem [shape: f32[88,32], index: 1, kind: input, shape index: {}]   ;;  %s457_s2 = inlined_call_operand.vmem [shape: f32[8,128], index: 2, kind: output, shape index: {}]  }
   0x1   :  { %v11_v0 = vld [vmem:[%s455_s0] sm:$0xff]  ;;  %v12_v2 = vld [vmem:[%s455_s0 + $0x8] sm:$0xff]  ;;  %333 = vrcp.f32 %v351_v4  ;;  %v16_v23 = vld [vmem:[%s456_s1 + $0x18] sm:$0xff] }
   0x2   :  { %v30_v1 = vsel %vm29_vm0, %v11_v0, 0.0  ;;  %v33_v3 = vsel %vm29_vm0, %v12_v2, 0.0  ;;  %v18_v21 = vld [vmem:[%s456_s1 + $0x28] sm:$0xff]  ;;  %v17_v22 = vld [vmem:[%s456_s1 + $0x20] sm:$0xff]  ;;  %v15_v24 = vld [vmem:[%s456_s1 + $0x10] sm:$0xff] }
   0x3   :  { %31 = vadd.xlane.f32.xlu0 %v30_v1  ;;  %106 = vmatpush.msra.mxu0 %v18_v21  ;;  %v328_v39 = vld [vmem:[%s456_s1 + $0x50] ss:$0 sm:$0xff]  ;;  %v329_v43 = vld [vmem:[%s456_s1 + $0x51] ss:$0 sm:$0xff]  ;;  %v330_v53 = vld [vmem:[%s456_s1 + $0x52] ss:$0 sm:$0xff] }
   0x5   :  { %107 = vmatpush.msra.mxu0 %v17_v22 }
   0x7   :  { %v334_v5 = vpop.eup %333  ;;  %108 = vmatpush.msra.mxu0 %v16_v23 }
   0x8   :  { %v37_v6 = vmul.f32 32.0, %v334_v5  ;;  %vm41_vm1 = vweird.f32 %v334_v5 }
   0x9   :  { %109 = vmatpush.msra.mxu0 %v15_v24 }
   0xa   :  { %v38_v7 = vsub.f32 1.0, %v37_v6 }
   0xb   :  { %34 = vadd.xlane.f32.xlu0 %v33_v3 }
   0xc   :  { %v39_v8 = vmul.f32 %v334_v5, %v38_v7 }
   0xe   :  { %v40_v9 = vadd.f32 %v334_v5, %v39_v8 }
  0x10   :  { %v377_v10 = vsel %vm41_vm1, %v334_v5, %v40_v9 }
  0x76   :  { %v32_v11 = vpop.xlane.xlu0 %31 }
  0x77   :  { %v43_v12 = vmul.f32 %v377_v10, %v32_v11 }
  0x79   :  { %v45_v13 = vsub.f32 %v11_v0, %v43_v12 }
  0x7b   :  { %v47_v14 = vmul.f32 %v45_v13, %v45_v13 }
  0x7d   :  { %v49_v15 = vsel %vm29_vm0, %v47_v14, 0.0 }
  0x7e   :  { %50 = vadd.xlane.f32.xlu1 %v49_v15  ;;  %v35_v16 = vpop.xlane.xlu0 %34 }
  0x7f   :  { %v44_v17 = vmul.f32 %v377_v10, %v35_v16 }
  0x81   :  { %v46_v18 = vsub.f32 %v12_v2, %v44_v17 }
  0x83   :  { %v48_v19 = vmul.f32 %v46_v18, %v46_v18 }
  0x85   :  { %v52_v20 = vsel %vm29_vm0, %v48_v19, 0.0 }
  0x86   :  { %53 = vadd.xlane.f32.xlu1 %v52_v20 }
  0xf1   :  { %v51_v25 = vpop.xlane.xlu1 %50 }
  0xf2   :  { %v55_v26 = vmul.f32 %v51_v25, %v377_v10 }
  0xf4   :  { %v57_v27 = vadd.f32 1e-05, %v55_v26 }
  0xf6   :  { %335 = vrsqrt.f32 %v57_v27  ;;  %vm65_vm3 = vweird.f32 %v57_v27 }
  0xf9   :  { %v54_v28 = vpop.xlane.xlu1 %53 }
  0xfa   :  { %v56_v29 = vmul.f32 %v54_v28, %v377_v10  ;;  %v21_v28 = vld [vmem:[%s456_s1 + $0x40] sm:$0xff] }
  0xfc   :  { %v336_v30 = vpop.eup %335  ;;  %v58_v31 = vadd.f32 1e-05, %v56_v29 }
  0xfd   :  { %v60_v32 = vmul.f32 %v336_v30, %v57_v27  ;;  %vm66_vm2 = vweird.f32 %v336_v30  ;;  %v22_v27 = vld [vmem:[%s456_s1 + $0x48] sm:$0xff] }
  0xfe   :  { %337 = vrsqrt.f32 %v58_v31  ;;  %vm67_vm4 = vmor %vm65_vm3, %vm66_vm2  ;;  %vm75_vm6 = vweird.f32 %v58_v31  ;;  %219 = vmatpush.msra.mxu1 %v22_v27 }
  0xff   :  { %v61_v33 = vmul.f32 %v336_v30, %v60_v32 }
 0x100   :  { %220 = vmatpush.msra.mxu1 %v21_v28 }
 0x101   :  { %v62_v34 = vmul.f32 0.5, %v61_v33 }
 0x103   :  { %v63_v35 = vsub.f32 1.5, %v62_v34 }
 0x104   :  { %v338_v36 = vpop.eup %337 }
 0x105   :  { %v64_v37 = vmul.f32 %v336_v30, %v63_v35  ;;  %v70_v38 = vmul.f32 %v338_v36, %v58_v31  ;;  %vm76_vm5 = vweird.f32 %v338_v36  ;;  %v19_v31 = vld [vmem:[%s456_s1 + $0x30] sm:$0xff] }
 0x106   :  { %vm77_vm7 = vmor %vm75_vm6, %vm76_vm5  ;;  %vm312_vm5 = vcmask 386048  }
 0x107   :  { %v68_v40 = vsel %vm67_vm4, %v336_v30, %v64_v37  ;;  %v71_v41 = vmul.f32 %v338_v36, %v70_v38  ;;  %v20_v30 = vld [vmem:[%s456_s1 + $0x38] sm:$0xff]  ;;  %vm282_vm4 = vcmask 130048  }
 0x108   :  { %v79_v42 = vmul.f32 %v68_v40, %v45_v13  ;;  %221 = vmatpush.msra.mxu1 %v20_v30 }
 0x109   :  { %v72_v44 = vmul.f32 0.5, %v71_v41  ;;  %v14_v41 = vld [vmem:[%s456_s1 + $0x8] sm:$0xff] }
 0x10a   :  { %v82_v45 = vmul.f32 %v328_v39, %v79_v42  ;;  %222 = vmatpush.msra.mxu1 %v19_v31  ;;  %321 = vmatpush.xpose.msk.msra.mxu2 %vm29_vm0, %v14_v41 }
 0x10b   :  { %v73_v46 = vsub.f32 1.5, %v72_v44  ;;  %300 = vmatpush.msra.mxu3 %v14_v41 }
 0x10c   :  { %v85_v47 = vadd.f32 %v329_v43, %v82_v45 }
 0x10d   :  { %v74_v48 = vmul.f32 %v338_v36, %v73_v46 }
 0x10e   :  { %318 = vmatmul.msk.f32.vlgmr.msra.gmra.mxu0 %vm29_vm0, %v85_v47  ;;  %v332_v47 = vld [vmem:[%s456_s1 + $0x54] ss:$0 sm:$0xff] }
 0x10f   :  { %v78_v49 = vsel %vm77_vm7, %v338_v36, %v74_v48 }
 0x110   :  { %v80_v50 = vmul.f32 %v78_v49, %v46_v18 }
 0x112   :  { %v83_v51 = vmul.f32 %v328_v39, %v80_v50 }
 0x114   :  { %v86_v52 = vadd.f32 %v329_v43, %v83_v51 }
 0x116   :  { %319 = vmatmul.msk.f32.gmra.mxu0 %vm29_vm0, %v86_v52 }
 0x18b   :  { %v111_v54 = vpop.f32.mrf.mxu0 }
 0x18c   :  { %v112_v55 = vadd.f32 %v330_v53, %v111_v54 }
 0x18e   :  { %v119_v56 = vmul.f32 %v112_v55, %v112_v55  ;;  %v117_v5 = vmul.f32 0.5, %v112_v55 }
 0x190   :  { %v121_v57 = vmul.f32 %v119_v56, %v112_v55 }
 0x192   :  { %v123_v58 = vmul.f32 0.044715, %v121_v57 }
 0x193   :  { %v114_v59 = vpop.f32.mrf.mxu0 }
 0x194   :  { %v115_v60 = vadd.f32 %v330_v53, %v114_v59  ;;  %v125_v61 = vadd.f32 %v123_v58, %v112_v55 }
 0x196   :  { %v120_v62 = vmul.f32 %v115_v60, %v115_v60  ;;  %v127_v63 = vmul.f32 0.7978846, %v125_v61  ;;  %v118_v11 = vmul.f32 0.5, %v115_v60 }
 0x198   :  { %v122_v0 = vmul.f32 %v120_v62, %v115_v60  ;;  %339 = vtanh.f32 %v127_v63 }
 0x19a   :  { %v124_v1 = vmul.f32 0.044715, %v122_v0 }
 0x19c   :  { %v126_v2 = vadd.f32 %v124_v1, %v115_v60 }
 0x19e   :  { %v340_v3 = vpop.eup %339  ;;  %v128_v4 = vmul.f32 0.7978846, %v126_v2 }
 0x19f   :  { %v131_v6 = vadd.f32 1.0, %v340_v3 }
 0x1a0   :  { %341 = vtanh.f32 %v128_v4 }
 0x1a1   :  { %v133_v7 = vmul.f32 %v131_v6, %v117_v5 }
 0x1a3   :  { %v135_v8 = vsel %vm29_vm0, %v133_v7, 0.0 }
 0x1a4   :  { %136 = vadd.xlane.f32.xlu2 %v135_v8  ;;  %v13_v8 = vld [vmem:[%s456_s1] sm:$0xff] }
 0x1a5   :  { %322 = vmatpush.xpose.msk.msra.mxu2 %vm29_vm0, %v13_v8  ;;  %301 = vmatpush.msra.mxu3 %v13_v8 }
 0x1a6   :  { %v342_v9 = vpop.eup %341 }
 0x1a7   :  { %v132_v12 = vadd.f32 1.0, %v342_v9  ;;  %v28_v9 = vld [vmem:[%s456_s1 + $0x55] sm:$0x1] }
 0x1a9   :  { %v134_v13 = vmul.f32 %v132_v12, %v118_v11  ;;  %v199_v11 = vmul.f32 8.0, %v28_v9 }
 0x1ab   :  { %v138_v14 = vsel %vm29_vm0, %v134_v13, 0.0  ;;  %v200_v12 = vperm.slane %v199_v11, 0 }
 0x1ac   :  { %139 = vadd.xlane.f32.xlu2 %v138_v14 }
 0x217   :  { %v137_v15 = vpop.xlane.xlu2 %136 }
 0x218   :  { %v141_v16 = vmul.f32 %v137_v15, %v377_v10 }
 0x21a   :  { %v143_v17 = vsub.f32 %v133_v7, %v141_v16 }
 0x21c   :  { %v145_v18 = vmul.f32 %v143_v17, %v143_v17 }
 0x21e   :  { %v147_v19 = vsel %vm29_vm0, %v145_v18, 0.0 }
 0x21f   :  { %148 = vadd.xlane.f32.xlu0 %v147_v19  ;;  %v140_v20 = vpop.xlane.xlu2 %139 }
 0x220   :  { %v142_v21 = vmul.f32 %v140_v20, %v377_v10 }
 0x222   :  { %v144_v22 = vsub.f32 %v134_v13, %v142_v21 }
 0x224   :  { %v146_v23 = vmul.f32 %v144_v22, %v144_v22 }
 0x226   :  { %v150_v24 = vsel %vm29_vm0, %v146_v23, 0.0 }
 0x227   :  { %151 = vadd.xlane.f32.xlu1 %v150_v24 }
 0x292   :  { %v149_v25 = vpop.xlane.xlu0 %148 }
 0x293   :  { %v153_v26 = vmul.f32 %v149_v25, %v377_v10 }
 0x295   :  { %v155_v29 = vadd.f32 1e-05, %v153_v26 }
 0x297   :  { %343 = vrsqrt.f32 %v155_v29  ;;  %vm163_vm9 = vweird.f32 %v155_v29 }
 0x29a   :  { %v152_v32 = vpop.xlane.xlu1 %151 }
 0x29b   :  { %v154_v33 = vmul.f32 %v152_v32, %v377_v10  ;;  %v331_v10 = vld [vmem:[%s456_s1 + $0x53] ss:$0 sm:$0xff] }
 0x29d   :  { %v344_v34 = vpop.eup %343  ;;  %v156_v35 = vadd.f32 1e-05, %v154_v33 }
 0x29e   :  { %v158_v36 = vmul.f32 %v344_v34, %v155_v29  ;;  %vm164_vm8 = vweird.f32 %v344_v34 }
 0x29f   :  { %345 = vrsqrt.f32 %v156_v35  ;;  %vm165_vm10 = vmor %vm163_vm9, %vm164_vm8  ;;  %vm173_vm12 = vweird.f32 %v156_v35 }
 0x2a0   :  { %v159_v37 = vmul.f32 %v344_v34, %v158_v36 }
 0x2a2   :  { %v160_v38 = vmul.f32 0.5, %v159_v37 }
 0x2a4   :  { %v161_v39 = vsub.f32 1.5, %v160_v38 }
 0x2a5   :  { %v346_v40 = vpop.eup %345 }
 0x2a6   :  { %v162_v42 = vmul.f32 %v344_v34, %v161_v39  ;;  %v168_v43 = vmul.f32 %v346_v40, %v156_v35  ;;  %vm174_vm11 = vweird.f32 %v346_v40  ;;  %v352_v35 = vmov 0.0  }
 0x2a7   :  { %vm175_vm13 = vmor %vm173_vm12, %vm174_vm11  ;;  %306 = vst [vmem:[%s457_s2] sm:$0xff] %v352_v35 }
 0x2a8   :  { %v166_v44 = vsel %vm165_vm10, %v344_v34, %v162_v42  ;;  %v169_v45 = vmul.f32 %v346_v40, %v168_v43 }
 0x2a9   :  { %v177_v46 = vmul.f32 %v166_v44, %v143_v17 }
 0x2aa   :  { %v170_v48 = vmul.f32 0.5, %v169_v45 }
 0x2ab   :  { %v180_v49 = vmul.f32 %v331_v10, %v177_v46 }
 0x2ac   :  { %v171_v50 = vsub.f32 1.5, %v170_v48 }
 0x2ad   :  { %v183_v51 = vadd.f32 %v332_v47, %v180_v49 }
 0x2ae   :  { %v172_v52 = vmul.f32 %v346_v40, %v171_v50 }
 0x2af   :  { %v185_v53 = vsel %vm29_vm0, %v183_v51, 0.0 }
 0x2b0   :  { %v176_v54 = vsel %vm175_vm13, %v346_v40, %v172_v52  ;;  %v186_v55 = vrot.slane %v185_v53, 4 }
 0x2b1   :  { %v178_v56 = vmul.f32 %v176_v54, %v144_v22 }
 0x2b2   :  { %v187_v57 = vadd.f32 %v186_v55, %v185_v53 }
 0x2b3   :  { %v181_v58 = vmul.f32 %v331_v10, %v178_v56 }
 0x2b4   :  { %v188_v60 = vrot.slane %v187_v57, 2 }
 0x2b5   :  { %v184_v59 = vadd.f32 %v332_v47, %v181_v58 }
 0x2b6   :  { %v189_v63 = vadd.f32 %v188_v60, %v187_v57 }
 0x2b7   :  { %v192_v61 = vsel %vm29_vm0, %v184_v59, 0.0 }
 0x2b8   :  { %v193_v62 = vrot.slane %v192_v61, 4  ;;  %v190_v2 = vrot.slane %v189_v63, 1 }
 0x2ba   :  { %v194_v0 = vadd.f32 %v193_v62, %v192_v61  ;;  %v191_v5 = vadd.f32 %v190_v2, %v189_v63 }
 0x2bc   :  { %v195_v1 = vrot.slane %v194_v0, 2 }
 0x2be   :  { %v196_v3 = vadd.f32 %v195_v1, %v194_v0 }
 0x2c0   :  { %v197_v4 = vrot.slane %v196_v3, 1 }
 0x2c2   :  { %v198_v6 = vadd.f32 %v197_v4, %v196_v3 }
 0x2c4   :  { %v204_v7 = vsel %vm203_vm14, %v198_v6, %v191_v5 }
 0x2c5   :  { %320 = vmatmul.msk.f32.vlgmr.msra.gmra.mxu1 %vm29_vm0, %v204_v7 }
 0x342   :  { %v224_v13 = vpop.f32.mrf.mxu1 }
 0x343   :  { %v225_v14 = vadd.f32 %v224_v13, %v200_v12 }
 0x345   :  { %323 = vmatmul.msk.f32.vlgmr.msra.gmra.mxu2 %vm29_vm0, %v225_v14 }
 0x3c8   :  { %v253_v15 = vpop.f32.mrf.mxu2 }
 0x3c9   :  { %v256_v16 = vmul.f32 0.17677669, %v253_v15 }
 0x3cb   :  { %v258_v17 = vsel %vm257_vm15, %v256_v16, -inf }
 0x3cc   :  { %259 = vmax.xlane.f32.xlu2 %v258_v17 }
 0x43f   :  { %v260_v18 = vpop.xlane.xlu2 %259 }
 0x440   :  { %v261_v19 = vsub.f32 %v256_v16, %v260_v18 }
 0x442   :  { %v262_v20 = vmul.f32 1.442695, %v261_v19 }
 0x444   :  { %347 = vpow2.f32 %v262_v20 }
 0x44a   :  { %v348_v21 = vpop.eup %347 }
 0x44b   :  { %v264_v22 = vsel %vm257_vm15, %v348_v21, 0.0 }
 0x44c   :  { %265 = vadd.xlane.f32.xlu0 %v264_v22 }
 0x4bf   :  { %v266_v23 = vpop.xlane.xlu0 %265 }
 0x4c0   :  { %349 = vrcp.f32 %v266_v23  ;;  %v278_v27 = vand.u32 2147483648, %v266_v23  ;;  %v276_v29 = vand.u32 2147483647, %v266_v23  ;;  %vm272_vm1 = vweird.f32 %v266_v23 }
 0x4c2   :  { %v279_v31 = vor.u32 1.1754944e-38, %v278_v27  ;;  %vm277_vm3 = vcmp.eq.f32.partialorder %v276_v29, 8.507059e+37 }
 0x4c6   :  { %v350_v24 = vpop.eup %349 }
 0x4c7   :  { %v268_v25 = vmul.f32 %v350_v24, %v266_v23  ;;  %vm273_vm0 = vweird.f32 %v350_v24 }
 0x4c8   :  { %vm274_vm2 = vmor %vm272_vm1, %vm273_vm0 }
 0x4c9   :  { %v269_v26 = vsub.f32 1.0, %v268_v25 }
 0x4cb   :  { %v270_v28 = vmul.f32 %v350_v24, %v269_v26 }
 0x4cd   :  { %v271_v30 = vadd.f32 %v350_v24, %v270_v28 }
 0x4cf   :  { %v275_v32 = vsel %vm274_vm2, %v350_v24, %v271_v30 }
 0x4d0   :  { %v280_v33 = vsel %vm277_vm3, %v279_v31, %v275_v32 }
 0x4d1   :  { %v281_v34 = vmul.f32 %v348_v21, %v280_v33 }
 0x4d3   :  { %324 = vmatmul.msk.f32.vlgmr.msra.gmra.mxu3 %vm282_vm4, %v281_v34 }
 0x556   :  { %v303_v36 = vpop.f32.mrf.mxu3 }
 0x557   :  { %308 = vrot.lane.b32.xlu1 %v303_v36, %s353_s16 }
 0x5c9   :  { %v309_v37 = vpop.permute.xlu1 %308 }
 0x5ca   :  { %v311_v38 = vsel %vm282_vm4, %v281_v34, %v309_v37 }
 0x5cb   :  { %313 = vst.msk [vmem:[%s457_s2] sm:$0x3] %vm312_vm5, %v311_v38 }

</bundles_post_ra>
